<compile_context>
chip_gen: v5e
topology: v5e:2x2
jax: 0.10.0
libtpu: 0.0.40
codegen_flags: <defaults>
</compile_context>

<pallas_src>
import jax
import jax.numpy as jnp
from jax.experimental import pallas as pl
from jax.experimental.pallas import tpu as pltpu


def _round_up(x: int, m: int) -> int:
    return ((x + m - 1) // m) * m


def _matmul_kernel_acc(x_ref, w_ref, o_ref, acc_ref):
    # x_ref: (tm, tk)   w_ref: (tk, tn)   o_ref: (tm, tn)   acc_ref: (tm, tn) f32
    @pl.when(pl.program_id(2) == 0)
    def _init():
        acc_ref[...] = jnp.zeros_like(acc_ref)

    acc_ref[...] += jnp.dot(
        x_ref[...], w_ref[...], preferred_element_type=jnp.float32
    )

    @pl.when(pl.program_id(2) == pl.num_programs(2) - 1)
    def _writeback():
        o_ref[...] = acc_ref[...].astype(o_ref.dtype)


def _matmul_kernel_single_k(x_ref, w_ref, o_ref):
    # Whole K reduction fits one tile: no accumulator scratch needed.
    o_ref[...] = jnp.dot(
        x_ref[...], w_ref[...], preferred_element_type=jnp.float32
    ).astype(o_ref.dtype)


def layer_forward(
    node_data: jax.Array,
    weight: jax.Array,
    *,
    tile_m: int = 256,
    tile_n: int = 256,
    tile_k: int = 512,
) -> jax.Array:
    """Pallas equivalent of Layer.forward (out = node_data @ weight.T, squeeze dim 0 if size 1)."""
    m, k = node_data.shape
    n, k_w = weight.shape
    assert k == k_w, "input_size mismatch between node_data and weight"

    out_dtype = node_data.dtype
    elt = jnp.dtype(out_dtype).itemsize

    # One-time HBM-side transpose: feed the MXU a (K, N) RHS, contracted plainly.
    w_t = weight.T  # (K, N)

    # Clamp base tiles to the aligned problem size; keep blocks (8,128)-aligned
    # and the output tile lane-dense (last dim a multiple of 128).
    tm = min(tile_m, _round_up(m, 8))
    tn = min(tile_n, _round_up(n, 128))
    tk = min(tile_k, _round_up(k, 128))

    m_pad = _round_up(m, tm)
    n_pad = _round_up(n, tn)
    k_pad = _round_up(k, tk)

    x_p = node_data
    if (m_pad, k_pad) != (m, k):
        x_p = jnp.pad(node_data, ((0, m_pad - m), (0, k_pad - k)))
    w_p = w_t
    if (k_pad, n_pad) != (k, n):
        w_p = jnp.pad(w_t, ((0, k_pad - k), (0, n_pad - n)))

    grid = (m_pad // tm, n_pad // tn, k_pad // tk)
    single_k = grid[2] == 1

    # VMEM budget: double-buffered x/w input tiles + double-buffered out tile
    # (+ f32 accumulator if present), with 2x headroom, clamped to stay safe on
    # v7x (64 MiB physical / 32 MiB default scoped).
    in_elt = jnp.dtype(x_p.dtype).itemsize
    vmem_needed = (
        2 * (tm * tk + tk * tn) * in_elt
        + 2 * tm * tn * elt
        + (0 if single_k else tm * tn * 4)
    )
    vmem_limit = int(min(max(2 * vmem_needed, 8 * 1024 * 1024), 32 * 1024 * 1024))

    cost = pl.CostEstimate(
        flops=2 * m_pad * n_pad * k_pad,
        transcendentals=0,
        bytes_accessed=(m_pad * k_pad + k_pad * n_pad + m_pad * n_pad) * elt,
    )

    kernel = _matmul_kernel_single_k if single_k else _matmul_kernel_acc
    scratch = [] if single_k else [pltpu.VMEM((tm, tn), jnp.float32)]

    out_p = pl.pallas_call(
        kernel,
        out_shape=jax.ShapeDtypeStruct((m_pad, n_pad), out_dtype),
        grid_spec=pltpu.PrefetchScalarGridSpec(
            num_scalar_prefetch=0,
            grid=grid,
            in_specs=[
                pl.BlockSpec((tm, tk), lambda i, j, kk: (i, kk)),
                pl.BlockSpec((tk, tn), lambda i, j, kk: (kk, j)),
            ],
            out_specs=pl.BlockSpec((tm, tn), lambda i, j, kk: (i, j)),
            scratch_shapes=scratch,
        ),
        compiler_params=pltpu.CompilerParams(
            dimension_semantics=("parallel", "parallel", "arbitrary"),
            vmem_limit_bytes=vmem_limit,
        ),
        cost_estimate=cost,
    )(x_p, w_p)

    out = out_p[:m, :n]

    # Reproduce torch `output.squeeze(dim=0)`: only squeezes if leading dim == 1.
    if out.shape[0] == 1:
        out = jnp.squeeze(out, axis=0)
    return out


def xavier_uniform(key, shape, dtype=jnp.float32):
    # PyTorch xavier_uniform_ for a 2-D weight (out, in):
    # bound = sqrt(6 / (fan_in + fan_out)), fan_in = in, fan_out = out.
    fan_out, fan_in = shape
    bound = (6.0 / (fan_in + fan_out)) ** 0.5
    return jax.random.uniform(key, shape, dtype=dtype, minval=-bound, maxval=bound)


if __name__ == "__main__":
    key = jax.random.PRNGKey(0)
    k_x, k_w, k_x2, k_w2 = jax.random.split(key, 4)

    # --- Small, module-consistent shapes (single-tile fast path with padding) ---
    num_nodes = 8
    input_size = 32
    out_size = 16

    node_data = jax.random.normal(k_x, (num_nodes, input_size), dtype=jnp.float32)
    weight = xavier_uniform(k_w, (out_size, input_size))

    out = jax.block_until_ready(layer_forward(node_data, weight))
    ref = jnp.dot(node_data, weight.T, precision=jax.lax.Precision.HIGHEST)
    assert out.shape == (num_nodes, out_size)
    assert jnp.allclose(out, ref, atol=1e-5, rtol=1e-5)

    # --- Larger shape exercising the multi-tile (M, N, K) grid + K reduction ---
    m2, k2, n2 = 512, 1024, 384
    node_data2 = jax.random.normal(k_x2, (m2, k2), dtype=jnp.float32)
    weight2 = xavier_uniform(k_w2, (n2, k2))

    out2 = jax.block_until_ready(layer_forward(node_data2, weight2))
    ref2 = jnp.dot(node_data2, weight2.T, precision=jax.lax.Precision.HIGHEST)
    assert out2.shape == (m2, n2)
    assert jnp.allclose(out2, ref2, atol=1e-2, rtol=1e-2)

    print("KERNEL_OK")
</pallas_src>

<mosaic_0001>
module attributes {stable_mosaic.version = 11 : i64} {
  func.func @_matmul_kernel_single_k(%arg0: i32, %arg1: i32, %arg2: i32, %arg3: memref<8x128xf32, #tpu.memory_space<vmem>>, %arg4: memref<128x128xf32, #tpu.memory_space<vmem>>, %arg5: memref<8x128xf32, #tpu.memory_space<vmem>>) attributes {dimension_semantics = [#tpu.dimension_semantics<parallel>, #tpu.dimension_semantics<parallel>, #tpu.dimension_semantics<arbitrary>], iteration_bounds = array<i64: 1, 1, 1>, scalar_prefetch = 0 : i64, scratch_operands = 0 : i64, tpu.core_type = #tpu.core_type<tc>, window_params = [{transform_indices = @transform_0, window_bounds = array<i64: 8, 128>}, {transform_indices = @transform_1, window_bounds = array<i64: 128, 128>}, {transform_indices = @transform_2, window_bounds = array<i64: 8, 128>}]} {
    %c0 = arith.constant 0 : index
    %c0_0 = arith.constant 0 : index
    %0 = vector.load %arg3[%c0, %c0_0] : memref<8x128xf32, #tpu.memory_space<vmem>>, vector<8x128xf32>
    %c0_1 = arith.constant 0 : index
    %c0_2 = arith.constant 0 : index
    %1 = vector.load %arg4[%c0_1, %c0_2] : memref<128x128xf32, #tpu.memory_space<vmem>>, vector<128x128xf32>
    %cst = arith.constant dense<0.000000e+00> : vector<8x128xf32>
    %2 = tpu.matmul %0, %1, %cst {dimension_numbers = #tpu.dot_dimension_numbers<[1], [0], [0], [1], [0, 0, 1, 1], [], []>} : vector<8x128xf32>, vector<128x128xf32>, vector<8x128xf32> -> vector<8x128xf32>
    %c0_3 = arith.constant 0 : index
    %c0_4 = arith.constant 0 : index
    %3 = vector.load %arg5[%c0_3, %c0_4] : memref<8x128xf32, #tpu.memory_space<vmem>>, vector<8x128xf32>
    tpu.vector_store %arg5[%c0_3, %c0_4], %2 {strides = array<i32>} : memref<8x128xf32, #tpu.memory_space<vmem>>, vector<8x128xf32>,
    return
  }
  func.func @transform_0(%arg0: i32, %arg1: i32, %arg2: i32) -> (i32, i32) {
    %c0_i32 = arith.constant 0 : i32
    return %arg0, %arg2 : i32, i32
  }
  func.func @transform_1(%arg0: i32, %arg1: i32, %arg2: i32) -> (i32, i32) {
    %c0_i32 = arith.constant 0 : i32
    return %arg2, %arg1 : i32, i32
  }
  func.func @transform_2(%arg0: i32, %arg1: i32, %arg2: i32) -> (i32, i32) {
    %c0_i32 = arith.constant 0 : i32
    return %arg0, %arg1 : i32, i32
  }
}

</mosaic_0001>

<bundles_post_ra>
// kernel: tpu_custom_call.1
= control target key start
LH: loop header
LB: loop body
LE: loop exit
PB: predicated region body
PF: predicated region fallthrough
CT: control target
= control target key end

     0   :  { %7 = vsyncpa [#allocation3], 0  ;;  %s210_s0 = inlined_call_operand.hbm [shape: f32[8,128], index: 0, kind: input, shape index: {}]   ;;  %s211_s1 = inlined_call_operand.hbm [shape: f32[128,128], index: 1, kind: input, shape index: {}]   ;;  %s212_s2 = inlined_call_operand.hbm [shape: f32[8,128], index: 2, kind: output, shape index: {}]  }
   0x1   :  { %8 = vsyncpa [#allocation6], 0 }
   0x2   :  { %9 = vsyncpa [#allocation4], 0  ;;  %s15_s11 = sshll.u32 %s210_s0, 4  ;;  %s181_s12 = smov [#allocation2]   ;;  %s16_s11 = int_to_ptr.hbm [resolvable:$true] %s15_s11 }
   0x3   :  { %s17_s13 = sshll.u32 %s181_s12, 4  ;;  %s25_s16 = sshll.u32 %s211_s1, 4  ;;  %s18_s13 = int_to_ptr.vmem [resolvable:$true] %s17_s13  ;;  %s26_s16 = int_to_ptr.hbm [resolvable:$true] %s25_s16 }
   0x4   :  { %20 = dma.hbm_to_vmem [thread:$0]  %s16_s11, 128, %s18_s13, [#allocation3]  }
   0x5   :  { %s182_s17 = smov [#allocation5]   ;;  %s183_s19 = smov 128  }
   0x6   :  { %s27_s18 = sshll.u32 %s182_s17, 4  ;;  %s184_s20 = smov 8   ;;  %s28_s18 = int_to_ptr.vmem [resolvable:$true] %s27_s18 }
   0x7   :  { %33 = dma.hbm_to_vmem [thread:$0]  %s26_s16, 2048, %s28_s18, [#allocation6], %s183_s19, %s183_s19, %s184_s20  }
   0x8   :  { %175 = dma.done.wait [#allocation3], 128  }
   0x9   :  { %176 = vsyncadd [#allocation3], 4294967168 }
   0xa   :  { %177 = dma.done.wait [#allocation6], 2048  }
   0xb   :  { %178 = vsyncadd [#allocation6], 4294965248  ;;  %v58_v0 = vld [vmem:[#allocation5 + $0x78] sm:$0xff]  ;;  %v57_v1 = vld [vmem:[#allocation5 + $0x70] sm:$0xff]  ;;  %s185_s0 = smov [#allocation7]   ;;  %s87_s23 = sshll.u32 %s212_s2, 4  ;;  %s88_s23 = int_to_ptr.hbm [resolvable:$true] %s87_s23 }
   0xc   :  { %59 = vmatpush.msra.mxu0 %v58_v0  ;;  %v56_v2 = vld [vmem:[#allocation5 + $0x68] sm:$0xff]  ;;  %v55_v3 = vld [vmem:[#allocation5 + $0x60] sm:$0xff]  ;;  %v54_v4 = vld [vmem:[#allocation5 + $0x58] sm:$0xff]  ;;  %s85_s1 = sshll.u32 %s185_s0, 4  ;;  %s86_s1 = int_to_ptr.vmem [resolvable:$true] %s85_s1 }
   0xd   :  { %v53_v5 = vld [vmem:[#allocation5 + $0x50] sm:$0xff]  ;;  %v52_v6 = vld [vmem:[#allocation5 + $0x48] sm:$0xff]  ;;  %v51_v7 = vld [vmem:[#allocation5 + $0x40] sm:$0xff] }
   0xe   :  { %60 = vmatpush.msra.mxu0 %v57_v1  ;;  %v50_v8 = vld [vmem:[#allocation5 + $0x38] sm:$0xff]  ;;  %v49_v9 = vld [vmem:[#allocation5 + $0x30] sm:$0xff]  ;;  %v48_v10 = vld [vmem:[#allocation5 + $0x28] sm:$0xff] }
   0xf   :  { %v47_v11 = vld [vmem:[#allocation5 + $0x20] sm:$0xff]  ;;  %v46_v12 = vld [vmem:[#allocation5 + $0x18] sm:$0xff]  ;;  %v45_v13 = vld [vmem:[#allocation5 + $0x10] sm:$0xff] }
  0x10   :  { %61 = vmatpush.msra.mxu0 %v56_v2  ;;  %v44_v14 = vld [vmem:[#allocation5 + $0x8] sm:$0xff]  ;;  %v43_v15 = vld [vmem:[#allocation5] sm:$0xff]  ;;  %v42_v16 = vld [vmem:[#allocation2] sm:$0xff] }
  0x12   :  { %62 = vmatpush.msra.mxu0 %v55_v3 }
  0x14   :  { %63 = vmatpush.msra.mxu0 %v54_v4 }
  0x16   :  { %64 = vmatpush.msra.mxu0 %v53_v5 }
  0x18   :  { %65 = vmatpush.msra.mxu0 %v52_v6 }
  0x1a   :  { %66 = vmatpush.msra.mxu0 %v51_v7 }
  0x1c   :  { %67 = vmatpush.msra.mxu0 %v50_v8 }
  0x1e   :  { %68 = vmatpush.msra.mxu0 %v49_v9 }
  0x20   :  { %69 = vmatpush.msra.mxu0 %v48_v10 }
  0x22   :  { %70 = vmatpush.msra.mxu0 %v47_v11 }
  0x24   :  { %71 = vmatpush.msra.mxu0 %v46_v12 }
  0x26   :  { %72 = vmatpush.msra.mxu0 %v45_v13 }
  0x28   :  { %73 = vmatpush.msra.mxu0 %v44_v14 }
  0x2a   :  { %74 = vmatpush.msra.mxu0 %v43_v15 }
  0x2b   :  { %75 = vmatmul.f32.vlgmr.msra.gmra.mxu0 %v42_v16 }
  0xa8   :  { %v76_v17 = vpop.f32.mrf.mxu0 }
  0xa9   :  { %79 = vst [vmem:[#allocation7] sm:$0xff] %v76_v17 }
  0xaa   :  { %90 = dma.vmem_to_hbm [thread:$0]  %s86_s1, 128, %s88_s23, [#allocation4]  }
  0xab   :  { %179 = dma.done.wait [#allocation4], 128  }
  0xac   :  { %180 = vsyncadd [#allocation4], 4294967168 }
  0xad   :  { %95 = vsyncpa [#allocation3], 1 }
  0xae   :  { %96 = vsyncpa [#allocation6], 1 }
  0xaf   :  { %97 = vsyncpa [#allocation4], 1 }

</bundles_post_ra>
